<compile_context>
chip_gen: v6e
topology: v6e:2x2x1
jax: 0.10.0
libtpu: 0.0.40
codegen_flags: <defaults>
</compile_context>

<pallas_src>
import jax
import jax.numpy as jnp
from jax.experimental import pallas as pl
from jax.experimental.pallas import tpu as pltpu

LN_EPS = 1e-5  # PyTorch nn.LayerNorm default


def classifier_kernel(x_ref, gamma_ref, beta_ref, w_ref, b_ref, o_ref):
    # x_ref: (tm, D) f32   gamma/beta: (1, D) f32
    # w_ref: (D, O_pad) bf16 (zero-padded cols)   b_ref: (1, O_pad) f32 (-inf in padded cols)
    # o_ref: (tm, O) f32   -- only the real classes are written back to HBM.
    x = x_ref[...]  # f32

    # --- One-pass LayerNorm over the feature (lane) axis ---
    mean = jnp.mean(x, axis=-1, keepdims=True)                 # (tm, 1)
    ex2 = jnp.mean(x * x, axis=-1, keepdims=True)              # (tm, 1)
    var = jnp.maximum(ex2 - mean * mean, 0.0)                  # clamp: avoid rsqrt(neg)
    h = (x - mean) * jax.lax.rsqrt(var + LN_EPS)
    h = h * gamma_ref[...] + beta_ref[...]                     # affine, broadcasts (1, D)

    # --- ReLU (f32 VPU path) ---
    h = jnp.maximum(h, 0.0)

    # --- Linear: bf16 operands, f32 accumulation on the MXU ---
    logits = jnp.dot(h.astype(jnp.bfloat16), w_ref[...],
                     preferred_element_type=jnp.float32) + b_ref[...]   # (tm, O_pad)
    # Padded classes: zero W columns + bias = -inf  ->  logits = -inf  ->  exp = 0.

    # --- Softmax over the (lane-dense, padded) class axis ---
    m = jnp.max(logits, axis=-1, keepdims=True)
    e = jnp.exp(logits - m)
    s = jnp.sum(e, axis=-1, keepdims=True)
    r = pl.reciprocal(s, approx=True)                          # EUP vrcp (free slot)
    r = r * (2.0 - s * r)                                      # one Newton step -> ~f32 exact
    probs = e * r                                              # (tm, O_pad)

    # Store only the real classes (masked vst; 8x less HBM writeback than O_pad=128 f32).
    n_out = o_ref.shape[-1]
    o_ref[...] = probs[:, :n_out].astype(o_ref.dtype)


def _round_up(n, m):
    return ((n + m - 1) // m) * m


def _choose_tile(batch, tm_max):
    # Largest tile <= tm_max, but at least 2 grid steps when the batch allows it,
    # so dimension_semantics=("parallel",) can balance the 2 TensorCores on v7x.
    half = _round_up(max((batch + 1) // 2, 1), 8)
    return max(8, min(tm_max, half))


def prepare_classifier_params(gamma, beta, w, b):
    """One-time parameter prep (hoisted out of the per-call path)."""
    D, O = w.shape
    O_pad = max(128, _round_up(O, 128))
    gamma2 = gamma.reshape(1, D).astype(jnp.float32)
    beta2 = beta.reshape(1, D).astype(jnp.float32)
    # Zero-pad W columns; cast once to bf16 for the MXU.
    w_p = jnp.pad(w.astype(jnp.float32), ((0, 0), (0, O_pad - O))).astype(jnp.bfloat16)
    # Padded bias entries = -inf so padded logits drop out of the softmax.
    b_p = jnp.pad(b.reshape(1, O).astype(jnp.float32),
                  ((0, 0), (0, O_pad - O)), constant_values=-jnp.inf)
    return gamma2, beta2, w_p, b_p, O


def classifier_forward(x, gamma2, beta2, w_p, b_p, out_dims, *, tm_max=2048):
    """x: (B, D); prepared params from prepare_classifier_params -> (B, out_dims) softmax."""
    B, D = x.shape
    O_pad = w_p.shape[1]
    if x.dtype != jnp.float32:
        x = x.astype(jnp.float32)

    tm = _choose_tile(B, tm_max)
    grid = (pl.cdiv(B, tm),)

    return pl.pallas_call(
        classifier_kernel,
        out_shape=jax.ShapeDtypeStruct((B, out_dims), jnp.float32),
        grid=grid,
        in_specs=[
            pl.BlockSpec((tm, D), lambda i: (i, 0)),      # x: streamed per batch tile
            pl.BlockSpec((1, D), lambda i: (0, 0)),       # gamma: resident
            pl.BlockSpec((1, D), lambda i: (0, 0)),       # beta: resident
            pl.BlockSpec((D, O_pad), lambda i: (0, 0)),   # W: resident
            pl.BlockSpec((1, O_pad), lambda i: (0, 0)),   # bias: resident
        ],
        out_specs=pl.BlockSpec((tm, out_dims), lambda i: (i, 0)),
        compiler_params=pltpu.CompilerParams(
            dimension_semantics=("parallel",),            # shards across 2 TCs on v7x
            vmem_limit_bytes=32 * 1024 * 1024,            # > v5e's 16 MiB default, < v7x's 64 MiB
        ),
    )(x, gamma2, beta2, w_p, b_p)


def reference_forward_f32(x, gamma, beta, w, b):
    """Pure-f32 semantics of the PyTorch module (two-pass LN, f32 matmul)."""
    mean = jnp.mean(x, axis=-1, keepdims=True)
    var = jnp.mean((x - mean) ** 2, axis=-1, keepdims=True)
    h = (x - mean) / jnp.sqrt(var + LN_EPS) * gamma + beta
    h = jnp.maximum(h, 0.0)
    logits = h @ w + b
    return jax.nn.softmax(logits, axis=1)


def reference_forward_kernel_math(x, gamma, beta, w, b):
    """Same math as the kernel (one-pass var, bf16 matmul operands, f32 accumulation)."""
    mean = jnp.mean(x, axis=-1, keepdims=True)
    ex2 = jnp.mean(x * x, axis=-1, keepdims=True)
    var = jnp.maximum(ex2 - mean * mean, 0.0)
    h = (x - mean) * jax.lax.rsqrt(var + LN_EPS) * gamma + beta
    h = jnp.maximum(h, 0.0)
    logits = jnp.dot(h.astype(jnp.bfloat16), w.astype(jnp.bfloat16),
                     preferred_element_type=jnp.float32) + b
    return jax.nn.softmax(logits, axis=1)


if __name__ == "__main__":
    # batch=300 (exercises the ragged last block: two ~152-row tiles), input_dims=32,
    # output_dims=16 (exercises internal lane-padding 16 -> 128 with O-only writeback).
    B, D, O = 300, 32, 16

    key = jax.random.PRNGKey(0)
    kx, kw, kb = jax.random.split(key, 3)

    x = jax.random.normal(kx, (B, D), dtype=jnp.float32)

    # PyTorch defaults: LN gamma=1, beta=0; Linear weight/bias ~ U(-1/sqrt(D), 1/sqrt(D)).
    gamma = jnp.ones((D,), dtype=jnp.float32)
    beta = jnp.zeros((D,), dtype=jnp.float32)
    bound = 1.0 / jnp.sqrt(jnp.float32(D))
    w = jax.random.uniform(kw, (D, O), minval=-bound, maxval=bound, dtype=jnp.float32)
    b = jax.random.uniform(kb, (O,), minval=-bound, maxval=bound, dtype=jnp.float32)

    # One-time parameter prep (hoisted out of the forward call).
    gamma2, beta2, w_p, b_p, out_dims = prepare_classifier_params(gamma, beta, w, b)

    out = classifier_forward(x, gamma2, beta2, w_p, b_p, out_dims)
    out = jax.block_until_ready(out)
    assert out.shape == (B, O)

    # Strict check against a reference using the same kernel math (bf16 matmul, one-pass var).
    ref_k = reference_forward_kernel_math(x, gamma, beta, w, b)
    assert jnp.allclose(out, ref_k, atol=1e-5, rtol=1e-5), "mismatch vs kernel-math reference"

    # Fidelity check against the pure-f32 module semantics (looser: bf16 MXU operands).
    ref_f32 = reference_forward_f32(x, gamma, beta, w, b)
    assert jnp.allclose(out, ref_f32, atol=2e-3, rtol=2e-2), "mismatch vs f32 reference"

    # Softmax rows must sum to 1 (padded classes masked out correctly).
    assert jnp.allclose(jnp.sum(out, axis=1), 1.0, atol=1e-5), "softmax rows must sum to 1"

    # TODO(synk): loss_fn / optimizer / train_step from the Model base class are training
    # utilities, not part of the forward pass, and are not implemented as kernels.

    print("KERNEL_OK")
</pallas_src>

<mosaic_0001>
module attributes {stable_mosaic.version = 11 : i64} {
  func.func @classifier_kernel(%arg0: i32, %arg1: memref<152x32xf32, #tpu.memory_space<vmem>>, %arg2: memref<1x32xf32, #tpu.memory_space<vmem>>, %arg3: memref<1x32xf32, #tpu.memory_space<vmem>>, %arg4: memref<32x128xbf16, #tpu.memory_space<vmem>>, %arg5: memref<1x128xf32, #tpu.memory_space<vmem>>, %arg6: memref<152x16xf32, #tpu.memory_space<vmem>>) attributes {dimension_semantics = [#tpu.dimension_semantics<parallel>], iteration_bounds = array<i64: 2>, scalar_prefetch = 0 : i64, scratch_operands = 0 : i64, tpu.core_type = #tpu.core_type<tc>, window_params = [{transform_indices = @transform_0, window_bounds = array<i64: 152, 32>}, {pipeline_mode = #tpu.pipeline_mode<synchronous>, transform_indices = @transform_1, window_bounds = array<i64: 1, 32>}, {pipeline_mode = #tpu.pipeline_mode<synchronous>, transform_indices = @transform_2, window_bounds = array<i64: 1, 32>}, {pipeline_mode = #tpu.pipeline_mode<synchronous>, transform_indices = @transform_3, window_bounds = array<i64: 32, 128>}, {pipeline_mode = #tpu.pipeline_mode<synchronous>, transform_indices = @transform_4, window_bounds = array<i64: 1, 128>}, {transform_indices = @transform_5, window_bounds = array<i64: 152, 16>}]} {
    %c0 = arith.constant 0 : index
    %c0_0 = arith.constant 0 : index
    %0 = vector.load %arg1[%c0, %c0_0] : memref<152x32xf32, #tpu.memory_space<vmem>>, vector<152x32xf32>
    %cst = arith.constant dense<0.000000e+00> : vector<152xf32>
    %1 = vector.multi_reduction <add>, %0, %cst [1] : vector<152x32xf32> to vector<152xf32>
    %2 = vector.shape_cast %1 : vector<152xf32> to vector<152x1xf32>
    %cst_1 = arith.constant 3.200000e+01 : f32
    %3 = vector.broadcast %cst_1 : f32 to vector<152x1xf32>
    %4 = arith.divf %2, %3 : vector<152x1xf32>
    %5 = arith.mulf %0, %0 : vector<152x32xf32>
    %cst_2 = arith.constant dense<0.000000e+00> : vector<152xf32>
    %6 = vector.multi_reduction <add>, %5, %cst_2 [1] : vector<152x32xf32> to vector<152xf32>
    %7 = vector.shape_cast %6 : vector<152xf32> to vector<152x1xf32>
    %cst_3 = arith.constant 3.200000e+01 : f32
    %8 = vector.broadcast %cst_3 : f32 to vector<152x1xf32>
    %9 = arith.divf %7, %8 : vector<152x1xf32>
    %10 = arith.mulf %4, %4 : vector<152x1xf32>
    %11 = arith.subf %9, %10 : vector<152x1xf32>
    %cst_4 = arith.constant 0.000000e+00 : f32
    %12 = vector.broadcast %cst_4 : f32 to vector<152x1xf32>
    %13 = arith.maximumf %11, %12 : vector<152x1xf32>
    %14 = vector.broadcast %4 : vector<152x1xf32> to vector<152x32xf32>
    %15 = arith.subf %0, %14 : vector<152x32xf32>
    %cst_5 = arith.constant 9.99999974E-6 : f32
    %16 = vector.broadcast %cst_5 : f32 to vector<152x1xf32>
    %17 = arith.addf %13, %16 : vector<152x1xf32>
    %18 = math.rsqrt %17 : vector<152x1xf32>
    %19 = vector.broadcast %18 : vector<152x1xf32> to vector<152x32xf32>
    %20 = arith.mulf %15, %19 : vector<152x32xf32>
    %c0_6 = arith.constant 0 : index
    %c0_7 = arith.constant 0 : index
    %21 = vector.load %arg2[%c0_6, %c0_7] : memref<1x32xf32, #tpu.memory_space<vmem>>, vector<1x32xf32>
    %22 = vector.broadcast %21 : vector<1x32xf32> to vector<152x32xf32>
    %23 = arith.mulf %20, %22 : vector<152x32xf32>
    %c0_8 = arith.constant 0 : index
    %c0_9 = arith.constant 0 : index
    %24 = vector.load %arg3[%c0_8, %c0_9] : memref<1x32xf32, #tpu.memory_space<vmem>>, vector<1x32xf32>
    %25 = vector.broadcast %24 : vector<1x32xf32> to vector<152x32xf32>
    %26 = arith.addf %23, %25 : vector<152x32xf32>
    %cst_10 = arith.constant 0.000000e+00 : f32
    %27 = vector.broadcast %cst_10 : f32 to vector<152x32xf32>
    %28 = arith.maximumf %26, %27 : vector<152x32xf32>
    %29 = arith.truncf %28 : vector<152x32xf32> to vector<152x32xbf16>
    %c0_11 = arith.constant 0 : index
    %c0_12 = arith.constant 0 : index
    %30 = vector.load %arg4[%c0_11, %c0_12] : memref<32x128xbf16, #tpu.memory_space<vmem>>, vector<32x128xbf16>
    %cst_13 = arith.constant dense<0.000000e+00> : vector<152x128xf32>
    %31 = tpu.matmul %29, %30, %cst_13 {dimension_numbers = #tpu.dot_dimension_numbers<[1], [0], [0], [1], [0, 0, 1, 1], [], []>} : vector<152x32xbf16>, vector<32x128xbf16>, vector<152x128xf32> -> vector<152x128xf32>
    %c0_14 = arith.constant 0 : index
    %c0_15 = arith.constant 0 : index
    %32 = vector.load %arg5[%c0_14, %c0_15] : memref<1x128xf32, #tpu.memory_space<vmem>>, vector<1x128xf32>
    %33 = vector.broadcast %32 : vector<1x128xf32> to vector<152x128xf32>
    %34 = arith.addf %31, %33 : vector<152x128xf32>
    %cst_16 = arith.constant dense<0xFF800000> : vector<152xf32>
    %35 = vector.multi_reduction <maximumf>, %34, %cst_16 [1] : vector<152x128xf32> to vector<152xf32>
    %36 = vector.shape_cast %35 : vector<152xf32> to vector<152x1xf32>
    %37 = vector.broadcast %36 : vector<152x1xf32> to vector<152x128xf32>
    %38 = arith.subf %34, %37 : vector<152x128xf32>
    %39 = math.exp %38 : vector<152x128xf32>
    %cst_17 = arith.constant dense<0.000000e+00> : vector<152xf32>
    %40 = vector.multi_reduction <add>, %39, %cst_17 [1] : vector<152x128xf32> to vector<152xf32>
    %41 = vector.shape_cast %40 : vector<152xf32> to vector<152x1xf32>
    %42 = tpu.reciprocal %41 {approx = true} : vector<152x1xf32> -> vector<152x1xf32>
    %43 = arith.mulf %41, %42 : vector<152x1xf32>
    %cst_18 = arith.constant 2.000000e+00 : f32
    %44 = vector.broadcast %cst_18 : f32 to vector<152x1xf32>
    %45 = arith.subf %44, %43 : vector<152x1xf32>
    %46 = arith.mulf %42, %45 : vector<152x1xf32>
    %47 = vector.broadcast %46 : vector<152x1xf32> to vector<152x128xf32>
    %48 = arith.mulf %39, %47 : vector<152x128xf32>
    %49 = vector.extract_strided_slice %48 {offsets = [0, 0], sizes = [152, 16], strides = [1, 1]} : vector<152x128xf32> to vector<152x16xf32>
    %c0_19 = arith.constant 0 : index
    %c0_20 = arith.constant 0 : index
    %50 = vector.load %arg6[%c0_19, %c0_20] : memref<152x16xf32, #tpu.memory_space<vmem>>, vector<152x16xf32>
    tpu.vector_store %arg6[%c0_19, %c0_20], %49 {strides = array<i32>} : memref<152x16xf32, #tpu.memory_space<vmem>>, vector<152x16xf32>,
    return
  }
  func.func @transform_0(%arg0: i32) -> (i32, i32) {
    %c0_i32 = arith.constant 0 : i32
    %c0_i32_0 = arith.constant 0 : i32
    return %arg0, %c0_i32 : i32, i32
  }
  func.func @transform_1(%arg0: i32) -> (i32, i32) {
    %c0_i32 = arith.constant 0 : i32
    %c0_i32_0 = arith.constant 0 : i32
    %c0_i32_1 = arith.constant 0 : i32
    return %c0_i32, %c0_i32_0 : i32, i32
  }
  func.func @transform_2(%arg0: i32) -> (i32, i32) {
    %c0_i32 = arith.constant 0 : i32
    %c0_i32_0 = arith.constant 0 : i32
    %c0_i32_1 = arith.constant 0 : i32
    return %c0_i32, %c0_i32_0 : i32, i32
  }
  func.func @transform_3(%arg0: i32) -> (i32, i32) {
    %c0_i32 = arith.constant 0 : i32
    %c0_i32_0 = arith.constant 0 : i32
    %c0_i32_1 = arith.constant 0 : i32
    return %c0_i32, %c0_i32_0 : i32, i32
  }
  func.func @transform_4(%arg0: i32) -> (i32, i32) {
    %c0_i32 = arith.constant 0 : i32
    %c0_i32_0 = arith.constant 0 : i32
    %c0_i32_1 = arith.constant 0 : i32
    return %c0_i32, %c0_i32_0 : i32, i32
  }
  func.func @transform_5(%arg0: i32) -> (i32, i32) {
    %c0_i32 = arith.constant 0 : i32
    %c0_i32_0 = arith.constant 0 : i32
    return %arg0, %c0_i32 : i32, i32
  }
}

</mosaic_0001>

<bundles_post_ra>
// kernel: tpu_custom_call.1
= control target key start
LH: loop header
LB: loop body
LE: loop exit
PB: predicated region body
PF: predicated region fallthrough
CT: control target
= control target key end

     0   :  { %s1330_s18 = smov 0   ;;  %s1869_s0 = inlined_call_operand.vmem [shape: f32[300,32], index: 0, kind: input, shape index: {}]   ;;  %s1870_s1 = inlined_call_operand.vmem [shape: f32[1,32], index: 1, kind: input, shape index: {}]   ;;  %s1871_s2 = inlined_call_operand.vmem [shape: f32[1,32], index: 2, kind: input, shape index: {}]   ;;  %s1872_s3 = inlined_call_operand.vmem [shape: bf16[32,128], index: 3, kind: input, shape index: {}]   ;;  %s1873_s4 = inlined_call_operand.vmem [shape: f32[1,128], index: 4, kind: input, shape index: {}]   ;;  %s1874_s5 = inlined_call_operand.vmem [shape: f32[300,16], index: 5, kind: output, shape index: {}]  }
   0x1 LB: > { %s1104_s19 = sadd.s32 4294967295, %s1298_s18   ;;  %p1108_p0 = scmp.ge.s32.totalorder %s1298_s18, 1  ;;  %s1298_s18 = sphi %s1330_s18, %s15_s18  }
   0x2   : > { %p188_p1 = scmp.lt.s32.totalorder %s1298_s18, 3 }
   0x4   : > { %p189_p2 = pnand %p1108_p0, %p188_p1 }
   0x5   : > { %s216_s20 = smul.u32 (!%p189_p2), 19, %s1104_s19 }
   0x6   : > { %192 = sbr.rel (%p189_p2) target bundleno = 784 (0x310), region = 40 }
   0x7   : > { %p217_p3 = scmp.lt.s32.totalorder (!%p189_p2), %s216_s20, 37 }
   0xb   : > { %s1876_s20 = smov (!%p217_p3, %s216_s20), 37  ;;  %vm248_vm0 = vcmask 261120   ;;  %v1176_v52 = vld [vmem:[%s1872_s3 + $0x8] sm:$0xff]   ;;  %v1177_v57 = vld [vmem:[%s1872_s3] sm:$0xff]   ;;  %vm1028_vm1 = vcmask 130048  }
   0xc   : > { %s1109_s21 = sshll.u32 %s1876_s20, 3  ;;  %1140 = vmatprep.subr.bf16.mxu0 %v1176_v52  ;;  %1164 = vmatprep.subr.bf16.mxu1 %v1176_v52 }
   0xd   : > { %s1346_s24 = scalar_lea.vmem %s1869_s0, %s1109_s21  ;;  %1141 = vmatpush3.bf16.msra.mxu0 %v1176_v52  ;;  %1166 = vmatpush3.bf16.msra.mxu1 %v1176_v52  ;;  %s1807_s12 = scalar_lea.vmem %s1874_s5, %s1109_s21 }
   0xe   : > { %v1349_v0 = vld [vmem:[%s1346_s24 + $0x10] sm:$0xff]  ;;  %v1352_v1 = vld [vmem:[%s1346_s24] sm:$0xff]  ;;  %v1355_v2 = vld [vmem:[%s1346_s24 + $0x18] sm:$0xff]  ;;  %1142 = vmatprep.subr.bf16.mxu0 %v1177_v57  ;;  %1165 = vmatprep.subr.bf16.mxu1 %v1177_v57 }
   0xf   : > { %v255_v3 = vsel %vm248_vm0, %v1349_v0, 0.0  ;;  %v249_v4 = vsel %vm248_vm0, %v1352_v1, 0.0  ;;  %v1362_v5 = vld [vmem:[%s1346_s24 + $0x8] sm:$0xff]  ;;  %v258_v6 = vsel %vm248_vm0, %v1355_v2, 0.0  ;;  %v326_v9 = vmul.f32 %v1352_v1, %v1352_v1  ;;  %v1384_v17 = vld [vmem:[%s1346_s24 + $0x20] sm:$0xff]  ;;  %v1401_v24 = vld [vmem:[%s1346_s24 + $0x38] sm:$0xff] }
  0x10   : > { %256 = vadd.xlane.f32.xlu1 %v255_v3  ;;  %250 = vadd.xlane.f32.xlu0 %v249_v4  ;;  %v252_v7 = vsel %vm248_vm0, %v1362_v5, 0.0  ;;  %v327_v8 = vmul.f32 %v1362_v5, %v1362_v5  ;;  %v329_v12 = vmul.f32 %v1355_v2, %v1355_v2  ;;  %v328_v13 = vmul.f32 %v1349_v0, %v1349_v0  ;;  %v1381_v16 = vld [vmem:[%s1346_s24 + $0x28] sm:$0xff]  ;;  %v1394_v21 = vld [vmem:[%s1346_s24 + $0x60] sm:$0xff]  ;;  %v1404_v25 = vld [vmem:[%s1346_s24 + $0x30] sm:$0xff] }
  0x11   : > { %v345_v11 = vsel %vm248_vm0, %v326_v9, 0.0  ;;  %v264_v18 = vsel %vm248_vm0, %v1381_v16, 0.0  ;;  %v261_v19 = vsel %vm248_vm0, %v1384_v17, 0.0  ;;  %v1391_v20 = vld [vmem:[%s1346_s24 + $0x68] sm:$0xff]  ;;  %v285_v23 = vsel %vm248_vm0, %v1394_v21, 0.0  ;;  %v1411_v28 = vld [vmem:[%s1346_s24 + $0x78] sm:$0xff]  ;;  %1143 = vmatpush3.bf16.msra.mxu0 %v1177_v57  ;;  %1167 = vmatpush3.bf16.msra.mxu1 %v1177_v57 }
  0x12   : > { %v348_v10 = vsel %vm248_vm0, %v327_v8, 0.0  ;;  %v354_v14 = vsel %vm248_vm0, %v329_v12, 0.0  ;;  %v351_v15 = vsel %vm248_vm0, %v328_v13, 0.0  ;;  %v288_v22 = vsel %vm248_vm0, %v1391_v20, 0.0  ;;  %v1414_v29 = vld [vmem:[%s1346_s24 + $0x70] sm:$0xff]  ;;  %v1445_v48 = vld [vmem:[%s1346_s24 + $0x48] sm:$0xff] }
  0x13   : > { %v270_v26 = vsel %vm248_vm0, %v1401_v24, 0.0  ;;  %v267_v27 = vsel %vm248_vm0, %v1404_v25, 0.0  ;;  %v294_v30 = vsel %vm248_vm0, %v1411_v28, 0.0  ;;  %v291_v31 = vsel %vm248_vm0, %v1414_v29, 0.0  ;;  %v1448_v49 = vld [vmem:[%s1346_s24 + $0x40] sm:$0xff]  ;;  %v1458_v53 = vld [vmem:[%s1346_s24 + $0x88] sm:$0xff] }
  0x14   : > { %259 = vadd.xlane.f32.xlu1 %v258_v6  ;;  %253 = vadd.xlane.f32.xlu0 %v252_v7  ;;  %v331_v32 = vmul.f32 %v1381_v16, %v1381_v16  ;;  %v330_v33 = vmul.f32 %v1384_v17, %v1384_v17  ;;  %v339_v36 = vmul.f32 %v1391_v20, %v1391_v20  ;;  %v276_v50 = vsel %vm248_vm0, %v1445_v48, 0.0  ;;  %v1461_v54 = vld [vmem:[%s1346_s24 + $0x80] sm:$0xff]  ;;  %v1471_v58 = vld [vmem:[%s1346_s24 + $0x58] sm:$0xff]  ;;  %v1474_v59 = vld [vmem:[%s1346_s24 + $0x50] sm:$0xff] }
  0x15   : > { %v338_v37 = vmul.f32 %v1394_v21, %v1394_v21  ;;  %v333_v40 = vmul.f32 %v1401_v24, %v1401_v24  ;;  %v332_v41 = vmul.f32 %v1404_v25, %v1404_v25  ;;  %v341_v44 = vmul.f32 %v1411_v28, %v1411_v28  ;;  %v1483_v63 = vld [vmem:[%s1346_s24 + $0x90] sm:$0xff] }
  0x16   : > { %v360_v34 = vsel %vm248_vm0, %v331_v32, 0.0  ;;  %v357_v35 = vsel %vm248_vm0, %v330_v33, 0.0  ;;  %v384_v38 = vsel %vm248_vm0, %v339_v36, 0.0  ;;  %v340_v45 = vmul.f32 %v1414_v29, %v1414_v29 }
  0x17   : > { %v381_v39 = vsel %vm248_vm0, %v338_v37, 0.0  ;;  %v366_v42 = vsel %vm248_vm0, %v333_v40, 0.0  ;;  %v363_v43 = vsel %vm248_vm0, %v332_v41, 0.0  ;;  %v390_v46 = vsel %vm248_vm0, %v341_v44, 0.0 }
  0x18   : > { %349 = vadd.xlane.f32.xlu1 %v348_v10  ;;  %346 = vadd.xlane.f32.xlu0 %v345_v11  ;;  %v387_v47 = vsel %vm248_vm0, %v340_v45, 0.0  ;;  %v273_v51 = vsel %vm248_vm0, %v1448_v49, 0.0  ;;  %v300_v55 = vsel %vm248_vm0, %v1458_v53, 0.0  ;;  %v297_v56 = vsel %vm248_vm0, %v1461_v54, 0.0 }
  0x19   : > { %v282_v60 = vsel %vm248_vm0, %v1471_v58, 0.0  ;;  %v279_v61 = vsel %vm248_vm0, %v1474_v59, 0.0  ;;  %v334_v62 = vmul.f32 %v1448_v49, %v1448_v49  ;;  %v303_v4 = vsel %vm248_vm0, %v1483_v63, 0.0 }
  0x1a   : > { %v342_v6 = vmul.f32 %v1461_v54, %v1461_v54  ;;  %v335_v7 = vmul.f32 %v1445_v48, %v1445_v48  ;;  %v336_v10 = vmul.f32 %v1474_v59, %v1474_v59  ;;  %v343_v11 = vmul.f32 %v1458_v53, %v1458_v53 }
  0x1b   : > { %v369_v3 = vsel %vm248_vm0, %v334_v62, 0.0 }
  0x1c   : > { %355 = vadd.xlane.f32.xlu1 %v354_v14  ;;  %352 = vadd.xlane.f32.xlu0 %v351_v15  ;;  %v393_v8 = vsel %vm248_vm0, %v342_v6, 0.0  ;;  %v372_v9 = vsel %vm248_vm0, %v335_v7, 0.0  ;;  %v375_v12 = vsel %vm248_vm0, %v336_v10, 0.0  ;;  %v396_v13 = vsel %vm248_vm0, %v343_v11, 0.0 }
  0x1d   : > { %v344_v14 = vmul.f32 %v1483_v63, %v1483_v63  ;;  %v337_v15 = vmul.f32 %v1471_v58, %v1471_v58 }
  0x20   : > { %265 = vadd.xlane.f32.xlu1 %v264_v18  ;;  %262 = vadd.xlane.f32.xlu0 %v261_v19  ;;  %v399_v18 = vsel %vm248_vm0, %v344_v14, 0.0  ;;  %v378_v19 = vsel %vm248_vm0, %v337_v15, 0.0 }
  0x24   : > { %289 = vadd.xlane.f32.xlu1 %v288_v22  ;;  %286 = vadd.xlane.f32.xlu0 %v285_v23 }
  0x28   : > { %271 = vadd.xlane.f32.xlu1 %v270_v26  ;;  %268 = vadd.xlane.f32.xlu0 %v267_v27 }
  0x2c   : > { %295 = vadd.xlane.f32.xlu1 %v294_v30  ;;  %292 = vadd.xlane.f32.xlu0 %v291_v31 }
  0x30   : > { %361 = vadd.xlane.f32.xlu1 %v360_v34  ;;  %358 = vadd.xlane.f32.xlu0 %v357_v35 }
  0x34   : > { %385 = vadd.xlane.f32.xlu1 %v384_v38  ;;  %382 = vadd.xlane.f32.xlu0 %v381_v39 }
  0x38   : > { %367 = vadd.xlane.f32.xlu1 %v366_v42  ;;  %364 = vadd.xlane.f32.xlu0 %v363_v43 }
  0x3c   : > { %391 = vadd.xlane.f32.xlu1 %v390_v46  ;;  %388 = vadd.xlane.f32.xlu0 %v387_v47 }
  0x40   : > { %277 = vadd.xlane.f32.xlu1 %v276_v50  ;;  %274 = vadd.xlane.f32.xlu0 %v273_v51 }
  0x44   : > { %301 = vadd.xlane.f32.xlu1 %v300_v55  ;;  %298 = vadd.xlane.f32.xlu0 %v297_v56 }
  0x48   : > { %283 = vadd.xlane.f32.xlu1 %v282_v60  ;;  %280 = vadd.xlane.f32.xlu0 %v279_v61 }
  0x4c   : > { %370 = vadd.xlane.f32.xlu1 %v369_v3  ;;  %304 = vadd.xlane.f32.xlu0 %v303_v4 }
  0x50   : > { %394 = vadd.xlane.f32.xlu1 %v393_v8  ;;  %373 = vadd.xlane.f32.xlu0 %v372_v9 }
  0x54   : > { %376 = vadd.xlane.f32.xlu1 %v375_v12  ;;  %397 = vadd.xlane.f32.xlu0 %v396_v13 }
  0x58   : > { %400 = vadd.xlane.f32.xlu1 %v399_v18  ;;  %379 = vadd.xlane.f32.xlu0 %v378_v19 }
  0x99   : > { %v257_v22 = vpop.xlane.xlu1 %256  ;;  %v251_v23 = vpop.xlane.xlu0 %250 }
  0x9a   : > { %v307_v30 = vmul.f32 0.03125, %v251_v23  ;;  %v1506_v33 = vmul.f32 0.03125, %v257_v22 }
  0x9c   : > { %v421_v37 = vmul.f32 %v307_v30, %v307_v30  ;;  %v423_v42 = vmul.f32 %v1506_v33, %v1506_v33  ;;  %v478_v19 = vsub.f32 %v1352_v1, %v307_v30 }
  0x9d   : > { %v260_v26 = vpop.xlane.xlu1 %259  ;;  %v254_v27 = vpop.xlane.xlu0 %253 }
  0x9e   : > { %v308_v31 = vmul.f32 0.03125, %v254_v27  ;;  %v1508_v34 = vmul.f32 0.03125, %v260_v26 }
  0xa0   : > { %v422_v32 = vmul.f32 %v308_v31, %v308_v31  ;;  %v424_v43 = vmul.f32 %v1508_v34, %v1508_v34  ;;  %v479_v22 = vsub.f32 %v1362_v5, %v308_v31  ;;  %v481_v1 = vsub.f32 %v1355_v2, %v1508_v34 }
  0xa1   : > { %v350_v35 = vpop.xlane.xlu1 %349  ;;  %v347_v36 = vpop.xlane.xlu0 %346 }
  0xa2   : > { %v403_v38 = vmul.f32 0.03125, %v350_v35  ;;  %v402_v39 = vmul.f32 0.03125, %v347_v36  ;;  %v1533_v36 = vld [vmem:[%s1870_s1] ss:$0 sm:$0xff] }
  0xa4   : > { %v441_v40 = vsub.f32 %v403_v38, %v422_v32  ;;  %v440_v41 = vsub.f32 %v402_v39, %v421_v37  ;;  %v480_v32 = vsub.f32 %v1349_v0, %v1506_v33 }
  0xa5   : > { %v356_v44 = vpop.xlane.xlu1 %355  ;;  %v353_v45 = vpop.xlane.xlu0 %352 }
  0xa6   : > { %v460_v46 = vmax.f32 %v441_v40, 0.0  ;;  %v459_v47 = vmax.f32 %v440_v41, 0.0  ;;  %v405_v50 = vmul.f32 0.03125, %v356_v44  ;;  %v404_v51 = vmul.f32 0.03125, %v353_v45  ;;  %v1546_v41 = vld [vmem:[%s1871_s2] ss:$0 sm:$0xff] }
  0xa8   : > { %v498_v52 = vadd.f32 1e-05, %v460_v46  ;;  %v497_v55 = vadd.f32 1e-05, %v459_v47  ;;  %v443_v56 = vsub.f32 %v405_v50, %v424_v43  ;;  %v442_v57 = vsub.f32 %v404_v51, %v423_v42 }
  0xa9   : > { %v266_v60 = vpop.xlane.xlu1 %265  ;;  %v263_v61 = vpop.xlane.xlu0 %262 }
  0xaa   : > { %1178 = vrsqrt.f32 %v498_v52  ;;  %v462_v62 = vmax.f32 %v443_v56, 0.0  ;;  %v461_v3 = vmax.f32 %v442_v57, 0.0  ;;  %v1514_v11 = vmul.f32 0.03125, %v266_v60 }
  0xab   : > { %1180 = vrsqrt.f32 %v497_v55  ;;  %v1516_v14 = vmul.f32 0.03125, %v263_v61 }
  0xac   : > { %v500_v4 = vadd.f32 1e-05, %v462_v62  ;;  %v499_v6 = vadd.f32 1e-05, %v461_v3  ;;  %v426_v5 = vmul.f32 %v1514_v11, %v1514_v11 }
  0xad   : > { %v290_v7 = vpop.xlane.xlu1 %289  ;;  %v287_v8 = vpop.xlane.xlu0 %286  ;;  %v425_v0 = vmul.f32 %v1516_v14, %v1516_v14 }
  0xae   : > { %1182 = vrsqrt.f32 %v500_v4  ;;  %v1518_v15 = vmul.f32 0.03125, %v290_v7  ;;  %v1522_v23 = vmul.f32 0.03125, %v287_v8 }
  0xaf   : > { %1184 = vrsqrt.f32 %v499_v6 }
  0xb0   : > { %v434_v33 = vmul.f32 %v1518_v15, %v1518_v15  ;;  %v433_v34 = vmul.f32 %v1522_v23, %v1522_v23 }
  0xb1   : > { %v272_v9 = vpop.xlane.xlu1 %271  ;;  %v269_v10 = vpop.xlane.xlu0 %268 }
  0xb2   : > { %v1524_v26 = vmul.f32 0.03125, %v272_v9  ;;  %v1528_v35 = vmul.f32 0.03125, %v269_v10 }
  0xb4   : > { %v428_v42 = vmul.f32 %v1524_v26, %v1524_v26  ;;  %v427_v46 = vmul.f32 %v1528_v35, %v1528_v35 }
  0xb5   : > { %v296_v12 = vpop.xlane.xlu1 %295  ;;  %v293_v13 = vpop.xlane.xlu0 %292 }
  0xb6   : > { %v1556_v52 = vmul.f32 0.03125, %v296_v12 }
  0xb7   : > { %v1179_v18 = vpop.eup %1178 }
  0xb8   : > { %v1181_v27 = vpop.eup %1180  ;;  %v536_v38 = vmul.f32 %v1179_v18, %v479_v22 }
  0xb9   : > { %v362_v30 = vpop.xlane.xlu1 %361  ;;  %v359_v31 = vpop.xlane.xlu0 %358  ;;  %v535_v37 = vmul.f32 %v1181_v27, %v478_v19  ;;  %v1562_v27 = vmul.f32 0.03125, %v293_v13 }
  0xba   : > { %v407_v39 = vmul.f32 0.03125, %v362_v30  ;;  %v406_v40 = vmul.f32 0.03125, %v359_v31  ;;  %v562_v44 = vmul.f32 %v1533_v36, %v536_v38 }
  0xbb   : > { %v1183_v2 = vpop.eup %1182  ;;  %v561_v43 = vmul.f32 %v1533_v36, %v535_v37 }
  0xbc   : > { %v1185_v45 = vpop.eup %1184  ;;  %v445_v47 = vsub.f32 %v407_v39, %v426_v5  ;;  %v444_v50 = vsub.f32 %v406_v40, %v425_v0  ;;  %v538_v51 = vmul.f32 %v1183_v2, %v481_v1  ;;  %v588_v60 = vadd.f32 %v1546_v41, %v562_v44 }
  0xbd   : > { %v386_v55 = vpop.xlane.xlu1 %385  ;;  %v383_v56 = vpop.xlane.xlu0 %382  ;;  %v587_v57 = vadd.f32 %v1546_v41, %v561_v43  ;;  %v537_v61 = vmul.f32 %v1185_v45, %v480_v32  ;;  %v436_v43 = vmul.f32 %v1556_v52, %v1556_v52  ;;  %v435_v44 = vmul.f32 %v1562_v27, %v1562_v27 }
  0xbe   : > { %v464_v62 = vmax.f32 %v445_v47, 0.0  ;;  %v463_v3 = vmax.f32 %v444_v50, 0.0  ;;  %v415_v4 = vmul.f32 0.03125, %v386_v55  ;;  %v414_v6 = vmul.f32 0.03125, %v383_v56 }
  0xbf   : > { %v606_v7 = vmax.f32 %v587_v57, 0.0  ;;  %v607_v8 = vmax.f32 %v588_v60, 0.0  ;;  %v563_v9 = vmul.f32 %v1533_v36, %v537_v61  ;;  %v564_v10 = vmul.f32 %v1533_v36, %v538_v51 }
  0xc0   : > { %v502_v18 = vadd.f32 1e-05, %v464_v62  ;;  %v501_v12 = vadd.f32 1e-05, %v463_v3  ;;  %v453_v19 = vsub.f32 %v415_v4, %v434_v33  ;;  %v452_v22 = vsub.f32 %v414_v6, %v433_v34 }
  0xc1   : > { %v368_v1 = vpop.xlane.xlu1 %367  ;;  %v365_v5 = vpop.xlane.xlu0 %364  ;;  %v625_v30 = vpack.c.bf16 %v607_v8, %v606_v7  ;;  %v589_v32 = vadd.f32 %v1546_v41, %v563_v9  ;;  %v590_v31 = vadd.f32 %v1546_v41, %v564_v10 }
  0xc2   : > { %1186 = vrsqrt.f32 %v502_v18  ;;  %v472_v37 = vmax.f32 %v453_v19, 0.0  ;;  %v471_v38 = vmax.f32 %v452_v22, 0.0  ;;  %v409_v0 = vmul.f32 0.03125, %v368_v1 }
  0xc3   : > { %1188 = vrsqrt.f32 %v501_v12  ;;  %v408_v39 = vmul.f32 0.03125, %v365_v5  ;;  %1144 = vmatprep.mubr.msk.bf16.mxu0 %vm248_vm0, %v625_v30  ;;  %v608_v40 = vmax.f32 %v589_v32, 0.0  ;;  %v609_v33 = vmax.f32 %v590_v31, 0.0 }
  0xc4   : > { %v510_v2 = vadd.f32 1e-05, %v472_v37  ;;  %v509_v13 = vadd.f32 1e-05, %v471_v38  ;;  %v447_v34 = vsub.f32 %v409_v0, %v428_v42  ;;  %v483_v19 = vsub.f32 %v1381_v16, %v1514_v11 }
  0xc5   : > { %v446_v45 = vsub.f32 %v408_v39, %v427_v46  ;;  %v392_v47 = vpop.xlane.xlu1 %391  ;;  %v389_v50 = vpop.xlane.xlu0 %388  ;;  %v626_v51 = vpack.c.bf16 %v609_v33, %v608_v40  ;;  %v482_v22 = vsub.f32 %v1384_v17, %v1516_v14  ;;  %v491_v30 = vsub.f32 %v1391_v20, %v1518_v15 }
  0xc6   : > { %1190 = vrsqrt.f32 %v510_v2  ;;  %v466_v55 = vmax.f32 %v447_v34, 0.0  ;;  %v417_v56 = vmul.f32 0.03125, %v392_v47  ;;  %v416_v57 = vmul.f32 0.03125, %v389_v50 }
  0xc7   : > { %1192 = vrsqrt.f32 %v509_v13  ;;  %v465_v60 = vmax.f32 %v446_v45, 0.0  ;;  %1145 = vmatmul.mubr.msk.bf16.vlgmr.msra.gmra.mxu0 %vm248_vm0, %v626_v51  ;;  %v490_v32 = vsub.f32 %v1394_v21, %v1522_v23  ;;  %v485_v16 = vsub.f32 %v1401_v24, %v1524_v26 }
  0xc8   : > { %v504_v61 = vadd.f32 1e-05, %v466_v55  ;;  %v455_v42 = vsub.f32 %v417_v56, %v436_v43  ;;  %v454_v62 = vsub.f32 %v416_v57, %v435_v44  ;;  %v484_v20 = vsub.f32 %v1404_v25, %v1528_v35 }
  0xc9   : > { %v503_v3 = vadd.f32 1e-05, %v465_v60  ;;  %v278_v4 = vpop.xlane.xlu1 %277  ;;  %v275_v6 = vpop.xlane.xlu0 %274  ;;  %v493_v21 = vsub.f32 %v1411_v28, %v1556_v52  ;;  %v492_v24 = vsub.f32 %v1414_v29, %v1562_v27 }
  0xca   : > { %1194 = vrsqrt.f32 %v504_v61  ;;  %v474_v7 = vmax.f32 %v455_v42, 0.0  ;;  %v473_v46 = vmax.f32 %v454_v62, 0.0  ;;  %v1576_v5 = vmul.f32 0.03125, %v278_v4 }
  0xcb   : > { %1196 = vrsqrt.f32 %v503_v3  ;;  %v1584_v11 = vmul.f32 0.03125, %v275_v6 }
  0xcc   : > { %v512_v8 = vadd.f32 1e-05, %v474_v7  ;;  %v511_v9 = vadd.f32 1e-05, %v473_v46  ;;  %v430_v26 = vmul.f32 %v1576_v5, %v1576_v5 }
  0xcd   : > { %v302_v10 = vpop.xlane.xlu1 %301  ;;  %v299_v18 = vpop.xlane.xlu0 %298  ;;  %v429_v43 = vmul.f32 %v1584_v11, %v1584_v11 }
  0xce   : > { %1198 = vrsqrt.f32 %v512_v8  ;;  %v1586_v17 = vmul.f32 0.03125, %v302_v10  ;;  %v1588_v14 = vmul.f32 0.03125, %v299_v18 }
  0xcf   : > { %v1187_v12 = vpop.eup %1186  ;;  %1200 = vrsqrt.f32 %v511_v9 }
  0xd0   : > { %v1189_v1 = vpop.eup %1188  ;;  %v540_v0 = vmul.f32 %v1187_v12, %v483_v19  ;;  %v1610_v29 = vmul.f32 %v1586_v17, %v1586_v17  ;;  %v437_v27 = vmul.f32 %v1588_v14, %v1588_v14 }
  0xd1   : > { %v284_v31 = vpop.xlane.xlu1 %283  ;;  %v281_v37 = vpop.xlane.xlu0 %280  ;;  %v539_v38 = vmul.f32 %v1189_v1, %v482_v22 }
  0xd2   : > { %v566_v23 = vmul.f32 %v1533_v36, %v540_v0  ;;  %v1600_v33 = vmul.f32 0.03125, %v284_v31  ;;  %v1602_v2 = vmul.f32 0.03125, %v281_v37 }
  0xd3   : > { %v1191_v39 = vpop.eup %1190  ;;  %v565_v15 = vmul.f32 %v1533_v36, %v539_v38 }
  0xd4   : > { %v1193_v40 = vpop.eup %1192  ;;  %v592_v28 = vadd.f32 %v1546_v41, %v566_v23  ;;  %v548_v34 = vmul.f32 %v1191_v39, %v491_v30  ;;  %v1618_v57 = vmul.f32 %v1600_v33, %v1600_v33  ;;  %v431_v60 = vmul.f32 %v1602_v2, %v1602_v2 }
  0xd5   : > { %v371_v13 = vpop.xlane.xlu1 %370  ;;  %v305_v25 = vpop.xlane.xlu0 %304  ;;  %v591_v35 = vadd.f32 %v1546_v41, %v565_v15  ;;  %v547_v52 = vmul.f32 %v1193_v40, %v490_v32 }
  0xd6   : > { %v410_v44 = vmul.f32 0.03125, %v371_v13  ;;  %v611_v50 = vmax.f32 %v592_v28, 0.0  ;;  %v574_v55 = vmul.f32 %v1533_v36, %v548_v34  ;;  %v1625_v19 = vmul.f32 0.03125, %v305_v25 }
  0xd7   : > { %v1195_v45 = vpop.eup %1194  ;;  %v610_v47 = vmax.f32 %v591_v35, 0.0  ;;  %v573_v51 = vmul.f32 %v1533_v36, %v547_v52 }
  0xd8   : > { %v1197_v56 = vpop.eup %1196  ;;  %v448_v61 = vsub.f32 %v410_v44, %v429_v43  ;;  %v542_v42 = vmul.f32 %v1195_v45, %v485_v16  ;;  %v600_v7 = vadd.f32 %v1546_v41, %v574_v55 }
  0xd9   : > { %v395_v62 = vpop.xlane.xlu1 %394  ;;  %v374_v3 = vpop.xlane.xlu0 %373  ;;  %v627_v4 = vpack.c.bf16 %v611_v50, %v610_v47  ;;  %v599_v6 = vadd.f32 %v1546_v41, %v573_v51  ;;  %v541_v46 = vmul.f32 %v1197_v56, %v484_v20 }
  0xda   : > { %v467_v8 = vmax.f32 %v448_v61, 0.0  ;;  %v418_v9 = vmul.f32 0.03125, %v395_v62  ;;  %v411_v10 = vmul.f32 0.03125, %v374_v3  ;;  %v568_v18 = vmul.f32 %v1533_v36, %v542_v42 }
  0xdb   : > { %v1199_v12 = vpop.eup %1198  ;;  %1148 = vmatprep.mubr.msk.bf16.mxu0 %vm248_vm0, %v627_v4  ;;  %v618_v22 = vmax.f32 %v599_v6, 0.0  ;;  %v619_v1 = vmax.f32 %v600_v7, 0.0  ;;  %v567_v30 = vmul.f32 %v1533_v36, %v541_v46 }
  0xdc   : > { %v1201_v32 = vpop.eup %1200  ;;  %v505_v31 = vadd.f32 1e-05, %v467_v8  ;;  %v456_v37 = vsub.f32 %v418_v9, %v437_v27  ;;  %v449_v38 = vsub.f32 %v411_v10, %v430_v26  ;;  %v594_v0 = vadd.f32 %v1546_v41, %v568_v18 }
  0xdd   : > { %v377_v16 = vpop.xlane.xlu1 %376  ;;  %v398_v39 = vpop.xlane.xlu0 %397  ;;  %v631_v20 = vpack.c.bf16 %v619_v1, %v618_v22  ;;  %v593_v15 = vadd.f32 %v1546_v41, %v567_v30  ;;  %v549_v23 = vmul.f32 %v1201_v32, %v492_v24  ;;  %v550_v40 = vmul.f32 %v1199_v12, %v493_v21 }
  0xde   : > { %1202 = vrsqrt.f32 %v505_v31  ;;  %v475_v13 = vmax.f32 %v456_v37, 0.0  ;;  %v468_v25 = vmax.f32 %v449_v38, 0.0  ;;  %v412_v35 = vmul.f32 0.03125, %v377_v16 }
  0xdf   : > { %v419_v28 = vmul.f32 0.03125, %v398_v39  ;;  %1156 = vmatprep.mubr.msk.bf16.mxu1 %vm248_vm0, %v631_v20  ;;  %v612_v52 = vmax.f32 %v593_v15, 0.0  ;;  %v613_v34 = vmax.f32 %v594_v0, 0.0  ;;  %v575_v26 = vmul.f32 %v1533_v36, %v549_v23 }
  0xe0   : > { %v513_v43 = vadd.f32 1e-05, %v475_v13  ;;  %v506_v27 = vadd.f32 1e-05, %v468_v25  ;;  %v450_v44 = vsub.f32 %v412_v35, %v431_v60  ;;  %v576_v45 = vmul.f32 %v1533_v36, %v550_v40 }
  0xe1   : > { %v439_v24 = vmul.f32 %v1625_v19, %v1625_v19  ;;  %v457_v21 = vsub.f32 %v419_v28, %v1610_v29  ;;  %v401_v47 = vpop.xlane.xlu1 %400  ;;  %v380_v50 = vpop.xlane.xlu0 %379  ;;  %v628_v51 = vpack.c.bf16 %v613_v34, %v612_v52  ;;  %v601_v55 = vadd.f32 %v1546_v41, %v575_v26 }
  0xe2   : > { %1204 = vrsqrt.f32 %v513_v43  ;;  %v469_v56 = vmax.f32 %v450_v44, 0.0  ;;  %v420_v61 = vmul.f32 0.03125, %v401_v47  ;;  %v413_v42 = vmul.f32 0.03125, %v380_v50 }
  0xe3   : > { %1206 = vrsqrt.f32 %v506_v27  ;;  %v476_v62 = vmax.f32 %v457_v21, 0.0  ;;  %1149 = vmatmul.mubr.msk.bf16.gmra.mxu0 %vm248_vm0, %v628_v51  ;;  %v602_v60 = vadd.f32 %v1546_v41, %v576_v45  ;;  %v620_v3 = vmax.f32 %v601_v55, 0.0 }
  0xe4   : > { %v507_v4 = vadd.f32 1e-05, %v469_v56  ;;  %v458_v6 = vsub.f32 %v420_v61, %v439_v24  ;;  %v451_v29 = vsub.f32 %v413_v42, %v1618_v57  ;;  %v486_v22 = vsub.f32 %v1448_v49, %v1584_v11 }
  0xe5   : > { %v514_v7 = vadd.f32 1e-05, %v476_v62  ;;  %v621_v46 = vmax.f32 %v602_v60, 0.0  ;;  %v494_v57 = vsub.f32 %v1461_v54, %v1588_v14  ;;  %v487_v31 = vsub.f32 %v1445_v48, %v1576_v5 }
  0xe6   : > { %1208 = vrsqrt.f32 %v507_v4  ;;  %v477_v8 = vmax.f32 %v458_v6, 0.0  ;;  %v470_v9 = vmax.f32 %v451_v29, 0.0  ;;  %v488_v39 = vsub.f32 %v1474_v59, %v1602_v2 }
  0xe7   : > { %1210 = vrsqrt.f32 %v514_v7  ;;  %v632_v10 = vpack.c.bf16 %v621_v46, %v620_v3  ;;  %v495_v11 = vsub.f32 %v1458_v53, %v1586_v17  ;;  %v489_v40 = vsub.f32 %v1471_v58, %v1600_v33 }
  0xe8   : > { %v515_v18 = vadd.f32 1e-05, %v477_v8  ;;  %v508_v12 = vadd.f32 1e-05, %v470_v9  ;;  %v496_v59 = vsub.f32 %v1483_v63, %v1625_v19 }
  0xe9   : > { %1157 = vmatmul.mubr.msk.bf16.vlgmr.msra.gmra.mxu1 %vm248_vm0, %v632_v10 }
  0xea   : > { %1212 = vrsqrt.f32 %v515_v18 }
  0xeb   : > { %v1203_v1 = vpop.eup %1202  ;;  %1214 = vrsqrt.f32 %v508_v12 }
  0xec   : > { %v543_v30 = vmul.f32 %v1203_v1, %v486_v22 }
  0xee   : > { %v569_v37 = vmul.f32 %v1533_v36, %v543_v30 }
  0xef   : > { %v1205_v32 = vpop.eup %1204 }
  0xf0   : > { %v1207_v38 = vpop.eup %1206  ;;  %v551_v0 = vmul.f32 %v1205_v32, %v494_v57  ;;  %v595_v54 = vadd.f32 %v1546_v41, %v569_v37 }
  0xf1   : > { %v544_v16 = vmul.f32 %v1207_v38, %v487_v31 }
  0xf2   : > { %v577_v14 = vmul.f32 %v1533_v36, %v551_v0  ;;  %v614_v17 = vmax.f32 %v595_v54, 0.0 }
  0xf3   : > { %v1209_v49 = vpop.eup %1208  ;;  %v570_v20 = vmul.f32 %v1533_v36, %v544_v16 }
  0xf4   : > { %v1211_v15 = vpop.eup %1210  ;;  %v545_v48 = vmul.f32 %v1209_v49, %v488_v39  ;;  %v603_v35 = vadd.f32 %v1546_v41, %v577_v14 }
  0xf5   : > { %v596_v5 = vadd.f32 %v1546_v41, %v570_v20  ;;  %v552_v23 = vmul.f32 %v1211_v15, %v495_v11 }
  0xf6   : > { %v571_v2 = vmul.f32 %v1533_v36, %v545_v48  ;;  %v622_v63 = vmax.f32 %v603_v35, 0.0 }
  0xf7   : > { %v1213_v53 = vpop.eup %1212  ;;  %v615_v13 = vmax.f32 %v596_v5, 0.0  ;;  %v578_v25 = vmul.f32 %v1533_v36, %v552_v23 }
  0xf8   : > { %v1215_v28 = vpop.eup %1214  ;;  %v597_v52 = vadd.f32 %v1546_v41, %v571_v2  ;;  %v553_v34 = vmul.f32 %v1213_v53, %v496_v59 }
  0xf9   : > { %v629_v26 = vpack.c.bf16 %v615_v13, %v614_v17  ;;  %v604_v43 = vadd.f32 %v1546_v41, %v578_v25  ;;  %v546_v58 = vmul.f32 %v1215_v28, %v489_v40 }
  0xfa   : > { %v579_v33 = vmul.f32 %v1533_v36, %v553_v34  ;;  %v616_v47 = vmax.f32 %v597_v52, 0.0 }
  0xfb   : > { %1152 = vmatprep.mubr.msk.bf16.mxu0 %vm248_vm0, %v629_v26  ;;  %v623_v19 = vmax.f32 %v604_v43, 0.0  ;;  %v572_v27 = vmul.f32 %v1533_v36, %v546_v58  ;;  %v1113_v36 = vld [vmem:[%s1873_s4] ss:$0 sm:$0xff] }
  0xfc   : > { %v605_v44 = vadd.f32 %v1546_v41, %v579_v33 }
  0xfd   : > { %v633_v45 = vpack.c.bf16 %v623_v19, %v622_v63  ;;  %v598_v24 = vadd.f32 %v1546_v41, %v572_v27 }
  0xfe   : > { %v624_v21 = vmax.f32 %v605_v44, 0.0 }
  0xff   : > { %1160 = vmatprep.mubr.msk.bf16.mxu1 %vm248_vm0, %v633_v45  ;;  %v617_v50 = vmax.f32 %v598_v24, 0.0 }
 0x100   : > { %v634_v51 = vpack.c.bf16 %v624_v21, %v624_v21 }
 0x101   : > { %v630_v55 = vpack.c.bf16 %v617_v50, %v616_v47 }
 0x102   : > { %1161 = vmatmul.mubr.msk.bf16.gmra.mxu1 %vm248_vm0, %v634_v51 }
 0x103   : > { %1153 = vmatmul.mubr.msk.bf16.gmra.mxu0 %vm248_vm0, %v630_v55 }
 0x187   : > { %v1146_v56 = vpop.f32.mrf.mxu0 }
 0x188   : > { %v731_v61 = vadd.f32 %v1146_v56, %v1113_v36 }
 0x189   : > { %v722_v42 = vpop.f32.mrf.mxu0 }
 0x18a   : > { %804 = vmax.xlane.f32.xlu0 %v731_v61  ;;  %v1680_v7 = vadd.f32 %v1113_v36, %v722_v42 }
 0x18b   : > { %v1147_v41 = vpop.f32.mrf.mxu0 }
 0x18c   : > { %v734_v62 = vadd.f32 %v1147_v41, %v1113_v36 }
 0x18d   : > { %v725_v6 = vpop.f32.mrf.mxu0 }
 0x18e   : > { %806 = vmax.xlane.f32.xlu1 %v734_v62  ;;  %v1686_v9 = vadd.f32 %v1113_v36, %v725_v6 }
 0x1a3   : > { %v1150_v8 = vpop.f32.mrf.mxu0 }
 0x1a4   : > { %v1692_v22 = vadd.f32 %v1150_v8, %v1113_v36 }
 0x1a5   : > { %v738_v18 = vpop.f32.mrf.mxu0 }
 0x1a6   : > { %v1698_v57 = vadd.f32 %v1113_v36, %v738_v18 }
 0x1a7   : > { %v1151_v30 = vpop.f32.mrf.mxu0 }
 0x1a8   : > { %v1700_v32 = vadd.f32 %v1151_v30, %v1113_v36 }
 0x1a9   : > { %v1158_v60 = vpop.f32.mrf.mxu1  ;;  %v741_v31 = vpop.f32.mrf.mxu0 }
 0x1aa   : > { %v1677_v3 = vadd.f32 %v1158_v60, %v1113_v36  ;;  %v1704_v37 = vadd.f32 %v1113_v36, %v741_v31 }
 0x1ab   : > { %v770_v4 = vpop.f32.mrf.mxu1 }
 0x1ac   : > { %828 = vmax.xlane.f32.xlu0 %v1677_v3  ;;  %v1688_v10 = vadd.f32 %v1113_v36, %v770_v4 }
 0x1ad   : > { %v1159_v29 = vpop.f32.mrf.mxu1 }
 0x1ae   : > { %v1682_v46 = vadd.f32 %v1159_v29, %v1113_v36 }
 0x1af   : > { %v773_v12 = vpop.f32.mrf.mxu1 }
 0x1b0   : > { %800 = vmax.xlane.f32.xlu0 %v1680_v7  ;;  %830 = vmax.xlane.f32.xlu1 %v1682_v46  ;;  %v1694_v1 = vadd.f32 %v1113_v36, %v773_v12 }
 0x1b4   : > { %802 = vmax.xlane.f32.xlu1 %v1686_v9  ;;  %824 = vmax.xlane.f32.xlu0 %v1688_v10 }
 0x1b8   : > { %826 = vmax.xlane.f32.xlu1 %v1694_v1  ;;  %812 = vmax.xlane.f32.xlu0 %v1692_v22 }
 0x1bc   : > { %814 = vmax.xlane.f32.xlu1 %v1700_v32  ;;  %808 = vmax.xlane.f32.xlu0 %v1698_v57 }
 0x1c0   : > { %810 = vmax.xlane.f32.xlu1 %v1704_v37 }
 0x1c2   : > { %v1162_v38 = vpop.f32.mrf.mxu1 }
 0x1c3   : > { %v1154_v0 = vpop.f32.mrf.mxu0  ;;  %v1724_v59 = vadd.f32 %v1162_v38, %v1113_v36 }
 0x1c4   : > { %v786_v16 = vpop.f32.mrf.mxu1  ;;  %v1712_v14 = vadd.f32 %v1154_v0, %v1113_v36 }
 0x1c5   : > { %v754_v39 = vpop.f32.mrf.mxu0  ;;  %v1707_v49 = vadd.f32 %v1113_v36, %v786_v16 }
 0x1c6   : > { %v1163_v11 = vpop.f32.mrf.mxu1  ;;  %v1718_v5 = vadd.f32 %v1113_v36, %v754_v39 }
 0x1c7   : > { %v1155_v20 = vpop.f32.mrf.mxu0  ;;  %832 = vmax.xlane.f32.xlu0 %v1707_v49 }
 0x1c8   : > { %v1710_v54 = vadd.f32 %v1155_v20, %v1113_v36  ;;  %v789_v23 = vpop.f32.mrf.mxu1 }
 0x1c9   : > { %v757_v15 = vpop.f32.mrf.mxu0  ;;  %v1722_v40 = vadd.f32 %v1113_v36, %v789_v23 }
 0x1ca   : > { %822 = vmax.xlane.f32.xlu1 %v1710_v54  ;;  %v1716_v48 = vadd.f32 %v1113_v36, %v757_v15 }
 0x1cb   : > { %820 = vmax.xlane.f32.xlu0 %v1712_v14 }
 0x1ce   : > { %818 = vmax.xlane.f32.xlu1 %v1716_v48 }
 0x1cf   : > { %816 = vmax.xlane.f32.xlu0 %v1718_v5 }
 0x1d2   : > { %834 = vmax.xlane.f32.xlu1 %v1722_v40 }
 0x1d3   : > { %836 = vmax.xlane.f32.xlu0 %v1724_v59 }
 0x213   : > { %v805_v2 = vpop.xlane.xlu0 %804 }
 0x214   : > { %v840_v53 = vsub.f32 %v731_v61, %v805_v2 }
 0x216   : > { %v861_v17 = vmul.f32 1.442695, %v840_v53 }
 0x217   : > { %v807_v13 = vpop.xlane.xlu1 %806 }
 0x218   : > { %1216 = vpow2.f32 %v861_v17  ;;  %v841_v25 = vsub.f32 %v734_v62, %v807_v13 }
 0x21a   : > { %v863_v35 = vmul.f32 1.442695, %v841_v25 }
 0x21c   : > { %1218 = vpow2.f32 %v863_v35 }
 0x225   : > { %v1728_v28 = vpop.eup %1216 }
 0x226   : > { %899 = vadd.xlane.f32.xlu1 %v1728_v28 }
 0x229   : > { %v1731_v52 = vpop.eup %1218 }
 0x22a   : > { %901 = vadd.xlane.f32.xlu0 %v1731_v52 }
 0x235   : > { %v829_v34 = vpop.xlane.xlu0 %828 }
 0x236   : > { %v852_v26 = vsub.f32 %v1677_v3, %v829_v34 }
 0x238   : > { %v885_v43 = vmul.f32 1.442695, %v852_v26 }
 0x239   : > { %v831_v58 = vpop.xlane.xlu1 %830  ;;  %v801_v33 = vpop.xlane.xlu0 %800 }
 0x23a   : > { %1220 = vpow2.f32 %v885_v43  ;;  %v853_v63 = vsub.f32 %v1682_v46, %v831_v58  ;;  %v838_v19 = vsub.f32 %v1680_v7, %v801_v33 }
 0x23c   : > { %v887_v27 = vmul.f32 1.442695, %v853_v63  ;;  %v857_v44 = vmul.f32 1.442695, %v838_v19 }
 0x23d   : > { %v803_v45 = vpop.xlane.xlu1 %802  ;;  %v825_v24 = vpop.xlane.xlu0 %824 }
 0x23e   : > { %1222 = vpow2.f32 %v887_v27  ;;  %v839_v21 = vsub.f32 %v1686_v9, %v803_v45  ;;  %v850_v47 = vsub.f32 %v1688_v10, %v825_v24 }
 0x23f   : > { %1224 = vpow2.f32 %v857_v44 }
 0x240   : > { %v859_v50 = vmul.f32 1.442695, %v839_v21  ;;  %v881_v51 = vmul.f32 1.442695, %v850_v47 }
 0x241   : > { %v827_v55 = vpop.xlane.xlu1 %826  ;;  %v813_v36 = vpop.xlane.xlu0 %812 }
 0x242   : > { %1226 = vpow2.f32 %v859_v50  ;;  %v851_v56 = vsub.f32 %v1694_v1, %v827_v55  ;;  %v844_v61 = vsub.f32 %v1692_v22, %v813_v36 }
 0x243   : > { %1228 = vpow2.f32 %v881_v51 }
 0x244   : > { %v883_v42 = vmul.f32 1.442695, %v851_v56  ;;  %v869_v41 = vmul.f32 1.442695, %v844_v61 }
 0x245   : > { %v815_v62 = vpop.xlane.xlu1 %814  ;;  %v809_v60 = vpop.xlane.xlu0 %808 }
 0x246   : > { %1230 = vpow2.f32 %v883_v42  ;;  %v845_v3 = vsub.f32 %v1700_v32, %v815_v62  ;;  %v842_v4 = vsub.f32 %v1698_v57, %v809_v60 }
 0x247   : > { %v1743_v6 = vpop.eup %1220  ;;  %1232 = vpow2.f32 %v869_v41 }
 0x248   : > { %v871_v29 = vmul.f32 1.442695, %v845_v3  ;;  %v865_v7 = vmul.f32 1.442695, %v842_v4  ;;  %923 = vadd.xlane.f32.xlu1 %v1743_v6 }
 0x249   : > { %v811_v46 = vpop.xlane.xlu1 %810 }
 0x24a   : > { %1234 = vpow2.f32 %v871_v29  ;;  %v843_v8 = vsub.f32 %v1704_v37, %v811_v46 }
 0x24b   : > { %v1747_v9 = vpop.eup %1222  ;;  %1236 = vpow2.f32 %v865_v7 }
 0x24c   : > { %v1749_v10 = vpop.eup %1224  ;;  %v867_v18 = vmul.f32 1.442695, %v843_v8  ;;  %925 = vadd.xlane.f32.xlu0 %v1747_v9 }
 0x24d   : > { %895 = vadd.xlane.f32.xlu1 %v1749_v10 }
 0x24e   : > { %1238 = vpow2.f32 %v867_v18 }
 0x24f   : > { %v1753_v12 = vpop.eup %1226 }
 0x250   : > { %v1755_v22 = vpop.eup %1228  ;;  %897 = vadd.xlane.f32.xlu0 %v1753_v12  ;;  %v833_v1 = vpop.xlane.xlu0 %832 }
 0x251   : > { %919 = vadd.xlane.f32.xlu1 %v1755_v22  ;;  %v854_v30 = vsub.f32 %v1707_v49, %v833_v1 }
 0x253   : > { %v1760_v57 = vpop.eup %1230  ;;  %v889_v32 = vmul.f32 1.442695, %v854_v30  ;;  %v823_v31 = vpop.xlane.xlu1 %822 }
 0x254   : > { %v1762_v37 = vpop.eup %1232  ;;  %921 = vadd.xlane.f32.xlu0 %v1760_v57  ;;  %v849_v38 = vsub.f32 %v1710_v54, %v823_v31  ;;  %v821_v0 = vpop.xlane.xlu0 %820 }
 0x255   : > { %1240 = vpow2.f32 %v889_v32  ;;  %907 = vadd.xlane.f32.xlu1 %v1762_v37  ;;  %v848_v16 = vsub.f32 %v1712_v14, %v821_v0 }
 0x256   : > { %v879_v39 = vmul.f32 1.442695, %v849_v38 }
 0x257   : > { %v1768_v11 = vpop.eup %1234  ;;  %v877_v49 = vmul.f32 1.442695, %v848_v16  ;;  %v819_v20 = vpop.xlane.xlu1 %818 }
 0x258   : > { %v1770_v15 = vpop.eup %1236  ;;  %1242 = vpow2.f32 %v879_v39  ;;  %909 = vadd.xlane.f32.xlu0 %v1768_v11  ;;  %v847_v23 = vsub.f32 %v1716_v48, %v819_v20  ;;  %v817_v2 = vpop.xlane.xlu0 %816 }
 0x259   : > { %1244 = vpow2.f32 %v877_v49  ;;  %903 = vadd.xlane.f32.xlu1 %v1770_v15  ;;  %v846_v54 = vsub.f32 %v1718_v5, %v817_v2 }
 0x25a   : > { %v875_v53 = vmul.f32 1.442695, %v847_v23 }
 0x25b   : > { %v1776_v14 = vpop.eup %1238  ;;  %v873_v17 = vmul.f32 1.442695, %v846_v54  ;;  %v835_v13 = vpop.xlane.xlu1 %834 }
 0x25c   : > { %1246 = vpow2.f32 %v875_v53  ;;  %905 = vadd.xlane.f32.xlu0 %v1776_v14  ;;  %v855_v25 = vsub.f32 %v1722_v40, %v835_v13  ;;  %v837_v35 = vpop.xlane.xlu0 %836 }
 0x25d   : > { %1248 = vpow2.f32 %v873_v17  ;;  %v856_v48 = vsub.f32 %v1724_v59, %v837_v35 }
 0x25e   : > { %v891_v34 = vmul.f32 1.442695, %v855_v25 }
 0x25f   : > { %v893_v26 = vmul.f32 1.442695, %v856_v48 }
 0x260   : > { %1250 = vpow2.f32 %v891_v34 }
 0x261   : > { %1252 = vpow2.f32 %v893_v26 }
 0x262   : > { %v1781_v43 = vpop.eup %1240 }
 0x263   : > { %927 = vadd.xlane.f32.xlu1 %v1781_v43 }
 0x265   : > { %v1784_v5 = vpop.eup %1242 }
 0x266   : > { %v1786_v58 = vpop.eup %1244  ;;  %917 = vadd.xlane.f32.xlu0 %v1784_v5 }
 0x267   : > { %915 = vadd.xlane.f32.xlu1 %v1786_v58 }
 0x269   : > { %v1790_v40 = vpop.eup %1246 }
 0x26a   : > { %v1792_v33 = vpop.eup %1248  ;;  %913 = vadd.xlane.f32.xlu0 %v1790_v40 }
 0x26b   : > { %911 = vadd.xlane.f32.xlu1 %v1792_v33 }
 0x26d   : > { %v1796_v59 = vpop.eup %1250 }
 0x26e   : > { %v1798_v63 = vpop.eup %1252  ;;  %929 = vadd.xlane.f32.xlu0 %v1796_v59 }
 0x26f   : > { %931 = vadd.xlane.f32.xlu1 %v1798_v63 }
 0x2af   : > { %v900_v19 = vpop.xlane.xlu1 %899 }
 0x2b0   : > { %1254 = vrcp.f32 %v900_v19 }
 0x2b3   : > { %v902_v27 = vpop.xlane.xlu0 %901 }
 0x2b4   : > { %1256 = vrcp.f32 %v902_v27 }
 0x2bd   : > { %v1255_v44 = vpop.eup %1254 }
 0x2be   : > { %v954_v45 = vmul.f32 %v1255_v44, %v900_v19 }
 0x2c0   : > { %v973_v24 = vsub.f32 2.0, %v954_v45 }
 0x2c1   : > { %v1257_v21 = vpop.eup %1256 }
 0x2c2   : > { %v992_v47 = vmul.f32 %v1255_v44, %v973_v24  ;;  %v955_v50 = vmul.f32 %v1257_v21, %v902_v27 }
 0x2c4   : > { %v1011_v51 = vmul.f32 %v1728_v28, %v992_v47  ;;  %v974_v55 = vsub.f32 2.0, %v955_v50 }
 0x2c6   : > { %1031 = vst.msk [vmem:[%s1807_s12 + $0x10] sm:$0xff] %vm1028_vm1, %v1011_v51  ;;  %v993_v36 = vmul.f32 %v1257_v21, %v974_v55 }
 0x2c8   : > { %v1012_v56 = vmul.f32 %v1731_v52, %v993_v36 }
 0x2ca   : > { %1032 = vst.msk [vmem:[%s1807_s12 + $0x18] sm:$0xff] %vm1028_vm1, %v1012_v56 }
 0x2d1   : > { %v924_v61 = vpop.xlane.xlu1 %923 }
 0x2d2   : > { %1258 = vrcp.f32 %v924_v61 }
 0x2d5   : > { %v926_v42 = vpop.xlane.xlu0 %925 }
 0x2d6   : > { %v896_v41 = vpop.xlane.xlu1 %895  ;;  %1260 = vrcp.f32 %v926_v42 }
 0x2d7   : > { %1262 = vrcp.f32 %v896_v41 }
 0x2d9   : > { %v898_v62 = vpop.xlane.xlu0 %897 }
 0x2da   : > { %v920_v60 = vpop.xlane.xlu1 %919  ;;  %1264 = vrcp.f32 %v898_v62 }
 0x2db   : > { %1266 = vrcp.f32 %v920_v60 }
 0x2dd   : > { %v922_v3 = vpop.xlane.xlu0 %921 }
 0x2de   : > { %v908_v28 = vpop.xlane.xlu1 %907  ;;  %1268 = vrcp.f32 %v922_v3 }
 0x2df   : > { %v1259_v4 = vpop.eup %1258  ;;  %1270 = vrcp.f32 %v908_v28 }
 0x2e0   : > { %v966_v29 = vmul.f32 %v1259_v4, %v924_v61 }
 0x2e1   : > { %v910_v7 = vpop.xlane.xlu0 %909 }
 0x2e2   : > { %v985_v52 = vsub.f32 2.0, %v966_v29  ;;  %v904_v46 = vpop.xlane.xlu1 %903  ;;  %1272 = vrcp.f32 %v910_v7 }
 0x2e3   : > { %v1261_v8 = vpop.eup %1260  ;;  %1274 = vrcp.f32 %v904_v46 }
 0x2e4   : > { %v1263_v18 = vpop.eup %1262  ;;  %v1004_v1 = vmul.f32 %v1259_v4, %v985_v52  ;;  %v967_v30 = vmul.f32 %v1261_v8, %v926_v42 }
 0x2e5   : > { %v952_v32 = vmul.f32 %v1263_v18, %v896_v41  ;;  %v906_v31 = vpop.xlane.xlu0 %905 }
 0x2e6   : > { %v1023_v38 = vmul.f32 %v1743_v6, %v1004_v1  ;;  %v986_v0 = vsub.f32 2.0, %v967_v30  ;;  %1276 = vrcp.f32 %v906_v31 }
 0x2e7   : > { %v1265_v16 = vpop.eup %1264  ;;  %v971_v39 = vsub.f32 2.0, %v952_v32 }
 0x2e8   : > { %v1267_v49 = vpop.eup %1266  ;;  %1043 = vst.msk [vmem:[%s1807_s12 + $0x70] sm:$0xff] %vm1028_vm1, %v1023_v38  ;;  %v1005_v20 = vmul.f32 %v1261_v8, %v986_v0  ;;  %v953_v23 = vmul.f32 %v1265_v16, %v898_v62 }
 0x2e9   : > { %v990_v2 = vmul.f32 %v1263_v18, %v971_v39  ;;  %v964_v54 = vmul.f32 %v1267_v49, %v920_v60 }
 0x2ea   : > { %v1024_v53 = vmul.f32 %v1747_v9, %v1005_v20  ;;  %v972_v17 = vsub.f32 2.0, %v953_v23 }
 0x2eb   : > { %v1269_v13 = vpop.eup %1268  ;;  %v1009_v25 = vmul.f32 %v1749_v10, %v990_v2  ;;  %v983_v6 = vsub.f32 2.0, %v964_v54 }
 0x2ec   : > { %v1271_v35 = vpop.eup %1270  ;;  %1044 = vst.msk [vmem:[%s1807_s12 + $0x78] sm:$0xff] %vm1028_vm1, %v1024_v53  ;;  %v991_v48 = vmul.f32 %v1265_v16, %v972_v17  ;;  %v965_v34 = vmul.f32 %v1269_v13, %v922_v3  ;;  %v928_v26 = vpop.xlane.xlu1 %927 }
 0x2ed   : > { %1029 = vst.msk [vmem:[%s1807_s12] sm:$0xff] %vm1028_vm1, %v1009_v25  ;;  %v1002_v19 = vmul.f32 %v1267_v49, %v983_v6  ;;  %v958_v27 = vmul.f32 %v1271_v35, %v908_v28  ;;  %1278 = vrcp.f32 %v928_v26 }
 0x2ee   : > { %v1010_v9 = vmul.f32 %v1753_v12, %v991_v48  ;;  %v984_v44 = vsub.f32 2.0, %v965_v34 }
 0x2ef   : > { %v1273_v45 = vpop.eup %1272  ;;  %v1021_v10 = vmul.f32 %v1755_v22, %v1002_v19  ;;  %v977_v24 = vsub.f32 2.0, %v958_v27  ;;  %v918_v21 = vpop.xlane.xlu0 %917 }
 0x2f0   : > { %v1275_v47 = vpop.eup %1274  ;;  %1030 = vst.msk [vmem:[%s1807_s12 + $0x8] sm:$0xff] %vm1028_vm1, %v1010_v9  ;;  %v1003_v50 = vmul.f32 %v1269_v13, %v984_v44  ;;  %v959_v51 = vmul.f32 %v1273_v45, %v910_v7  ;;  %1280 = vrcp.f32 %v918_v21  ;;  %v916_v55 = vpop.xlane.xlu1 %915 }
 0x2f1   : > { %1041 = vst.msk [vmem:[%s1807_s12 + $0x60] sm:$0xff] %vm1028_vm1, %v1021_v10  ;;  %v996_v36 = vmul.f32 %v1271_v35, %v977_v24  ;;  %v956_v56 = vmul.f32 %v1275_v47, %v904_v46  ;;  %1282 = vrcp.f32 %v916_v55 }
 0x2f2   : > { %v1022_v12 = vmul.f32 %v1760_v57, %v1003_v50  ;;  %v978_v61 = vsub.f32 2.0, %v959_v51 }
 0x2f3   : > { %v1277_v22 = vpop.eup %1276  ;;  %v1015_v42 = vmul.f32 %v1762_v37, %v996_v36  ;;  %v975_v41 = vsub.f32 2.0, %v956_v56  ;;  %v914_v62 = vpop.xlane.xlu0 %913 }
 0x2f4   : > { %1042 = vst.msk [vmem:[%s1807_s12 + $0x68] sm:$0xff] %vm1028_vm1, %v1022_v12  ;;  %v997_v60 = vmul.f32 %v1273_v45, %v978_v61  ;;  %v957_v3 = vmul.f32 %v1277_v22, %v906_v31  ;;  %1284 = vrcp.f32 %v914_v62  ;;  %v912_v28 = vpop.xlane.xlu1 %911 }
 0x2f5   : > { %1035 = vst.msk [vmem:[%s1807_s12 + $0x30] sm:$0xff] %vm1028_vm1, %v1015_v42  ;;  %v994_v4 = vmul.f32 %v1275_v47, %v975_v41  ;;  %1286 = vrcp.f32 %v912_v28 }
 0x2f6   : > { %v1016_v57 = vmul.f32 %v1768_v11, %v997_v60  ;;  %v976_v29 = vsub.f32 2.0, %v957_v3 }
 0x2f7   : > { %v1013_v7 = vmul.f32 %v1770_v15, %v994_v4  ;;  %v930_v37 = vpop.xlane.xlu0 %929 }
 0x2f8   : > { %1036 = vst.msk [vmem:[%s1807_s12 + $0x38] sm:$0xff] %vm1028_vm1, %v1016_v57  ;;  %v995_v52 = vmul.f32 %v1277_v22, %v976_v29  ;;  %1288 = vrcp.f32 %v930_v37  ;;  %v932_v46 = vpop.xlane.xlu1 %931 }
 0x2f9   : > { %1033 = vst.msk [vmem:[%s1807_s12 + $0x20] sm:$0xff] %vm1028_vm1, %v1013_v7  ;;  %1290 = vrcp.f32 %v932_v46 }
 0x2fa   : > { %v1279_v8 = vpop.eup %1278  ;;  %v1014_v18 = vmul.f32 %v1776_v14, %v995_v52 }
 0x2fb   : > { %v968_v1 = vmul.f32 %v1279_v8, %v928_v26 }
 0x2fc   : > { %1034 = vst.msk [vmem:[%s1807_s12 + $0x28] sm:$0xff] %vm1028_vm1, %v1014_v18 }
 0x2fd   : > { %v1281_v11 = vpop.eup %1280  ;;  %v987_v30 = vsub.f32 2.0, %v968_v1 }
 0x2fe   : > { %v1283_v32 = vpop.eup %1282  ;;  %v963_v15 = vmul.f32 %v1281_v11, %v918_v21 }
 0x2ff   : > { %v1006_v31 = vmul.f32 %v1279_v8, %v987_v30  ;;  %v962_v38 = vmul.f32 %v1283_v32, %v916_v55 }
 0x300   : > { %v982_v0 = vsub.f32 2.0, %v963_v15 }
 0x301   : > { %v1285_v16 = vpop.eup %1284  ;;  %v1025_v39 = vmul.f32 %v1781_v43, %v1006_v31  ;;  %v981_v49 = vsub.f32 2.0, %v962_v38 }
 0x302   : > { %v1287_v20 = vpop.eup %1286  ;;  %v1001_v23 = vmul.f32 %v1281_v11, %v982_v0  ;;  %v961_v14 = vmul.f32 %v1285_v16, %v914_v62 }
 0x303   : > { %1045 = vst.msk [vmem:[%s1807_s12 + $0x80] sm:$0xff] %vm1028_vm1, %v1025_v39  ;;  %v1000_v2 = vmul.f32 %v1283_v32, %v981_v49  ;;  %v960_v54 = vmul.f32 %v1287_v20, %v912_v28 }
 0x304   : > { %v1020_v53 = vmul.f32 %v1784_v5, %v1001_v23  ;;  %v980_v17 = vsub.f32 2.0, %v961_v14 }
 0x305   : > { %v1289_v13 = vpop.eup %1288  ;;  %v1019_v25 = vmul.f32 %v1786_v58, %v1000_v2  ;;  %v979_v6 = vsub.f32 2.0, %v960_v54 }
 0x306   : > { %v1291_v35 = vpop.eup %1290  ;;  %1040 = vst.msk [vmem:[%s1807_s12 + $0x58] sm:$0xff] %vm1028_vm1, %v1020_v53  ;;  %v999_v43 = vmul.f32 %v1285_v16, %v980_v17  ;;  %v969_v48 = vmul.f32 %v1289_v13, %v930_v37 }
 0x307   : > { %1039 = vst.msk [vmem:[%s1807_s12 + $0x50] sm:$0xff] %vm1028_vm1, %v1019_v25  ;;  %v998_v34 = vmul.f32 %v1287_v20, %v979_v6  ;;  %v970_v26 = vmul.f32 %v1291_v35, %v932_v46 }
 0x308   : > { %v1018_v5 = vmul.f32 %v1790_v40, %v999_v43  ;;  %v988_v19 = vsub.f32 2.0, %v969_v48 }
 0x309   : > { %v1017_v27 = vmul.f32 %v1792_v33, %v998_v34  ;;  %v989_v9 = vsub.f32 2.0, %v970_v26 }
 0x30a   : > { %1038 = vst.msk [vmem:[%s1807_s12 + $0x48] sm:$0xff] %vm1028_vm1, %v1018_v5  ;;  %v1007_v58 = vmul.f32 %v1289_v13, %v988_v19 }
 0x30b   : > { %1037 = vst.msk [vmem:[%s1807_s12 + $0x40] sm:$0xff] %vm1028_vm1, %v1017_v27  ;;  %v1008_v44 = vmul.f32 %v1291_v35, %v989_v9 }
 0x30c   : > { %v1026_v45 = vmul.f32 %v1796_v59, %v1007_v58 }
 0x30d   : > { %v1027_v10 = vmul.f32 %v1798_v63, %v1008_v44 }
 0x30e   : > { %1046 = vst.msk [vmem:[%s1807_s12 + $0x88] sm:$0xff] %vm1028_vm1, %v1026_v45 }
 0x30f   : > { %1047 = vst.msk [vmem:[%s1807_s12 + $0x90] sm:$0xff] %vm1028_vm1, %v1027_v10 }
 0x310 PF: > { %s15_s18 = sadd.s32 1, %s1298_s18  }
 0x311   : > { %p12_p4 = scmp.ge.s32.totalorder %s15_s18, 4  }
 0x313   :  { %14 = sbr.rel (!%p12_p4) target bundleno = 1 (0x1), region = 70 }

</bundles_post_ra>
